<compile_context>
chip_gen: v5e
topology: v5e:2x2
jax: 0.10.0
libtpu: 0.0.40
codegen_flags: <defaults>
</compile_context>

<pallas_src>
import functools

import jax
import jax.numpy as jnp
from jax import lax
from jax.experimental import pallas as pl
from jax.experimental.pallas import tpu as pltpu


def _round_up(x, m):
    return (x + m - 1) // m * m


def _choose_tiles(n, d, e, w, adj_itemsize, budget_bytes):
    """Pick (tn, tk) dividing n (largest first) that fit the VMEM budget."""
    if n <= 512:
        return n, n                                        # single full-extent tile
    for tn in (512, 256, 128):                             # dst rows per tile
        if n % tn:
            continue
        for tk in (1024, 512, 256, 128):                   # src (reduction) per tile
            if n % tk:
                continue
            est = (2 * e * tn * tk * adj_itemsize          # adjacency blocks (double buffered)
                   + e * tn * tk * 2                       # bf16 operand temporaries
                   + 2 * tk * d * 4 + 2 * tn * d * 4       # xk / xn blocks
                   + 2 * e * tk * 4                        # src scales
                   + 2 * tn * w * 4                        # output slab
                   + e * tn * (d + 1) * 4)                 # accumulators
            if est <= budget_bytes:
                return tn, tk
    return 128, 128


def _gcn_kernel(adj_ref, xk_ref, xn_ref, a_ref, out_ref, acc_ref, deg_ref,
                *, num_etypes, feat_dim, sep):
    # adj_ref: (E, tk, tn)      src-major adjacency tile: adj[e, u, v]
    # xk_ref : (tk, D) f32      source-node features for this reduction tile
    # xn_ref : (tn, D) f32      dst-node features (pass-through columns)
    # a_ref  : (E, tk, 1) f32   source (out-degree) scales
    # out_ref: (tn, W)  f32     fused output slab, resident across k
    # acc_ref: (E, tn, D) f32   aggregation accumulators, resident across k
    # deg_ref: (E, tn, 1) f32   in-degree accumulators, resident across k
    k = pl.program_id(1)
    nk = pl.num_programs(1)

    @pl.when(k == 0)
    def _init():
        acc_ref[...] = jnp.zeros_like(acc_ref)
        deg_ref[...] = jnp.zeros_like(deg_ref)

    x_blk = xk_ref[...]                                     # (tk, D) f32
    tk = x_blk.shape[0]
    ones_col = jnp.ones((tk, 1), dtype=jnp.bfloat16)        # for in-degree accumulation
    contract_src = (((0,), (0,)), ((), ()))                 # contract the src axis (adj^T @ rhs)

    for e in range(num_etypes):                             # static unroll; E is small
        adj_tile = adj_ref[e]                               # (tk, tn)
        if adj_tile.dtype != jnp.bfloat16:
            adj_tile = adj_tile.astype(jnp.bfloat16)        # 0/1 values -> exact in bf16
        xs = (x_blk * a_ref[e]).astype(jnp.bfloat16)        # (tk, D), out-degree pre-scale
        # agg partial: sum_u adj[u, v] * a[u] * x[u, :]  -> (tn, D), f32 accumulation
        acc_ref[e] += lax.dot_general(adj_tile, xs, contract_src,
                                      preferred_element_type=jnp.float32)
        # in-degree partial: sum_u adj[u, v]             -> (tn, 1), exact integers
        deg_ref[e] += lax.dot_general(adj_tile, ones_col, contract_src,
                                      preferred_element_type=jnp.float32)

    @pl.when(k == nk - 1)
    def _finalize():
        base = 0
        if sep:
            out_ref[:, 0:feat_dim] = xn_ref[...]
            base = feat_dim
        for e in range(num_etypes):
            in_deg = deg_ref[e]                             # (tn, 1)
            b = lax.rsqrt(jnp.where(in_deg == 0.0, 1.0, in_deg))
            lo = base + e * feat_dim
            out_ref[:, lo:lo + feat_dim] = (b * acc_ref[e]).astype(out_ref.dtype)


def gcn_aggregate(adj, x, sep=True):
    """adj: (E, N, N) dense adjacency per edge type (adj[e, u, v] = edge u->v);
    x: (N, D) node features.  Returns (N, (E+1)*D) if sep else (N, E*D)."""
    adj = jnp.asarray(adj)
    if not jnp.issubdtype(adj.dtype, jnp.floating):
        adj = adj.astype(jnp.float32)
    x = jnp.asarray(x, jnp.float32)
    E, N, N2 = adj.shape
    assert N == N2, adj.shape
    Nx, D = x.shape
    assert Nx == N, (x.shape, adj.shape)

    # --- single pre-pass over the adjacency: source (out-) degrees only.
    # in-degrees are accumulated inside the kernel.  Clamp BEFORE rsqrt:
    # zero-degree rows/cols of adj are structurally all zero, so this matches
    # the reference prod==0 -> 1 rule exactly (and avoids inf * 0 = NaN).
    out_deg = jnp.sum(adj, axis=2, dtype=jnp.float32)                 # (E, N)
    src_scale = lax.rsqrt(jnp.where(out_deg == 0.0, 1.0, out_deg))[..., None]

    # --- pad N only when it is large and has no 128-aligned tiling.
    # Padded rows/cols are harmless: degree 0 -> scale 1, features 0.
    Np = N if N <= 512 else _round_up(N, 128)
    if Np != N:
        pad = Np - N
        adj = jnp.pad(adj, ((0, 0), (0, pad), (0, pad)))
        x_pad = jnp.pad(x, ((0, pad), (0, 0)))
        src_scale = jnp.pad(src_scale, ((0, 0), (0, pad), (0, 0)),
                            constant_values=1.0)
    else:
        x_pad = x

    out_width = (E + 1) * D if sep else E * D
    tn, tk = _choose_tiles(Np, D, E, out_width, adj.dtype.itemsize,
                           budget_bytes=28 * 1024 * 1024)

    kernel = functools.partial(_gcn_kernel, num_etypes=E, feat_dim=D, sep=sep)

    out = pl.pallas_call(
        kernel,
        out_shape=jax.ShapeDtypeStruct((Np, out_width), jnp.float32),
        grid_spec=pltpu.PrefetchScalarGridSpec(
            num_scalar_prefetch=0,
            grid=(Np // tn, Np // tk),                     # (dst tiles, reduction tiles)
            in_specs=[
                pl.BlockSpec((E, tk, tn), lambda n, k: (0, k, n)),   # adjacency (src-major)
                pl.BlockSpec((tk, D), lambda n, k: (k, 0)),          # x (source rows)
                pl.BlockSpec((tn, D), lambda n, k: (n, 0)),          # x (dst rows, copy)
                pl.BlockSpec((E, tk, 1), lambda n, k: (0, k, 0)),    # out-degree scales
            ],
            out_specs=pl.BlockSpec((tn, out_width), lambda n, k: (n, 0)),
            scratch_shapes=[pltpu.VMEM((E, tn, D), jnp.float32),     # aggregation acc
                            pltpu.VMEM((E, tn, 1), jnp.float32)],    # in-degree acc
        ),
        compiler_params=pltpu.CompilerParams(
            dimension_semantics=("parallel", "arbitrary"),
            vmem_limit_bytes=40 * 1024 * 1024),
    )(adj, x_pad, x_pad, src_scale)

    return out[:N] if Np != N else out


def _reference(adj, x, sep=True):
    parts = [x] if sep else []
    for e in range(adj.shape[0]):
        a = adj[e]
        out_deg = a.sum(axis=1, keepdims=True)
        in_deg = a.sum(axis=0, keepdims=True)
        prod = out_deg * in_deg
        prod = jnp.where(prod == 0.0, 1.0, prod)
        norm = 1.0 / jnp.sqrt(prod)
        parts.append((a * norm).T @ x)
    return jnp.concatenate(parts, axis=-1)


if __name__ == "__main__":
    key = jax.random.PRNGKey(0)
    k_adj, k_x = jax.random.split(key)

    E = 2    # number of edge types
    N = 16   # number of nodes
    D = 32   # feature dim

    # Deterministic random graph: ~30% edge density per edge type.
    adj = jax.random.bernoulli(k_adj, p=0.3, shape=(E, N, N)).astype(jnp.float32)
    x = jax.random.normal(k_x, (N, D), dtype=jnp.float32)

    out = jax.block_until_ready(gcn_aggregate(adj, x, sep=True))
    ref = _reference(adj, x, sep=True)
    assert out.shape == (N, (E + 1) * D), out.shape
    # bf16 MXU operands (x * a rounded once per tile) -> tolerance ~1e-2.
    assert jnp.allclose(out, ref, atol=3e-2, rtol=3e-2), (
        "mismatch vs reference (sep=True), max abs diff = %g"
        % float(jnp.max(jnp.abs(out - ref))))

    out_ns = jax.block_until_ready(gcn_aggregate(adj, x, sep=False))
    ref_ns = _reference(adj, x, sep=False)
    assert out_ns.shape == (N, E * D), out_ns.shape
    assert jnp.allclose(out_ns, ref_ns, atol=3e-2, rtol=3e-2), (
        "mismatch vs reference (sep=False), max abs diff = %g"
        % float(jnp.max(jnp.abs(out_ns - ref_ns))))

    print("KERNEL_OK")
</pallas_src>

<mosaic_0001>
module attributes {stable_mosaic.version = 11 : i64} {
  func.func @_gcn_kernel(%arg0: i32, %arg1: i32, %arg2: memref<2x16x16xf32, #tpu.memory_space<vmem>>, %arg3: memref<16x32xf32, #tpu.memory_space<vmem>>, %arg4: memref<16x32xf32, #tpu.memory_space<vmem>>, %arg5: memref<2x16x1xf32, #tpu.memory_space<vmem>>, %arg6: memref<16x96xf32, #tpu.memory_space<vmem>>, %arg7: memref<2x16x32xf32, #tpu.memory_space<vmem>>, %arg8: memref<2x16x1xf32, #tpu.memory_space<vmem>>) attributes {dimension_semantics = [#tpu.dimension_semantics<parallel>, #tpu.dimension_semantics<arbitrary>], iteration_bounds = array<i64: 1, 1>, scalar_prefetch = 0 : i64, scratch_operands = 2 : i64, tpu.core_type = #tpu.core_type<tc>, window_params = [{transform_indices = @transform_0, window_bounds = array<i64: 2, 16, 16>}, {transform_indices = @transform_1, window_bounds = array<i64: 16, 32>}, {transform_indices = @transform_2, window_bounds = array<i64: 16, 32>}, {transform_indices = @transform_3, window_bounds = array<i64: 2, 16, 1>}, {transform_indices = @transform_4, window_bounds = array<i64: 16, 96>}]} {
    %c0_i32 = arith.constant 0 : i32
    %0 = arith.cmpi eq, %arg1, %c0_i32 : i32
    %1 = arith.extui %0 : i1 to i32
    %c0_i32_0 = arith.constant 0 : i32
    %2 = arith.cmpi ne, %1, %c0_i32_0 : i32
    scf.if %2 {
      %cst_43 = arith.constant 0.000000e+00 : f32
      %52 = vector.broadcast %cst_43 : f32 to vector<2x16x32xf32>
      %c0_44 = arith.constant 0 : index
      %c0_45 = arith.constant 0 : index
      %c0_46 = arith.constant 0 : index
      %53 = vector.load %arg7[%c0_44, %c0_45, %c0_46] : memref<2x16x32xf32, #tpu.memory_space<vmem>>, vector<2x16x32xf32>
      tpu.vector_store %arg7[%c0_44, %c0_45, %c0_46], %52 {strides = array<i32>} : memref<2x16x32xf32, #tpu.memory_space<vmem>>, vector<2x16x32xf32>,
      %cst_47 = arith.constant 0.000000e+00 : f32
      %54 = vector.broadcast %cst_47 : f32 to vector<2x16x1xf32>
      %c0_48 = arith.constant 0 : index
      %c0_49 = arith.constant 0 : index
      %c0_50 = arith.constant 0 : index
      %55 = vector.load %arg8[%c0_48, %c0_49, %c0_50] : memref<2x16x1xf32, #tpu.memory_space<vmem>>, vector<2x16x1xf32>
      tpu.vector_store %arg8[%c0_48, %c0_49, %c0_50], %54 {strides = array<i32>} : memref<2x16x1xf32, #tpu.memory_space<vmem>>, vector<2x16x1xf32>,
    } else {
    }
    %c0 = arith.constant 0 : index
    %c0_1 = arith.constant 0 : index
    %3 = vector.load %arg3[%c0, %c0_1] : memref<16x32xf32, #tpu.memory_space<vmem>>, vector<16x32xf32>
    %cst = arith.constant 1.000000e+00 : bf16
    %4 = vector.broadcast %cst : bf16 to vector<16x1xbf16>
    %c0_2 = arith.constant 0 : index
    %c0_3 = arith.constant 0 : index
    %c0_4 = arith.constant 0 : index
    %5 = vector.load %arg2[%c0_2, %c0_3, %c0_4] : memref<2x16x16xf32, #tpu.memory_space<vmem>>, vector<1x16x16xf32>
    %6 = vector.shape_cast %5 : vector<1x16x16xf32> to vector<16x16xf32>
    %7 = arith.truncf %6 : vector<16x16xf32> to vector<16x16xbf16>
    %c0_5 = arith.constant 0 : index
    %c0_6 = arith.constant 0 : index
    %c0_7 = arith.constant 0 : index
    %8 = vector.load %arg5[%c0_5, %c0_6, %c0_7] : memref<2x16x1xf32, #tpu.memory_space<vmem>>, vector<1x16x1xf32>
    %9 = vector.shape_cast %8 : vector<1x16x1xf32> to vector<16x1xf32>
    %10 = vector.broadcast %9 : vector<16x1xf32> to vector<16x32xf32>
    %11 = arith.mulf %3, %10 : vector<16x32xf32>
    %12 = arith.truncf %11 : vector<16x32xf32> to vector<16x32xbf16>
    %c0_8 = arith.constant 0 : index
    %c0_9 = arith.constant 0 : index
    %c0_10 = arith.constant 0 : index
    %13 = vector.load %arg7[%c0_8, %c0_9, %c0_10] : memref<2x16x32xf32, #tpu.memory_space<vmem>>, vector<1x16x32xf32>
    %14 = vector.shape_cast %13 : vector<1x16x32xf32> to vector<16x32xf32>
    %cst_11 = arith.constant dense<0.000000e+00> : vector<16x32xf32>
    %15 = tpu.matmul %7, %12, %cst_11 {dimension_numbers = #tpu.dot_dimension_numbers<[0], [0], [1], [1], [0, 1, 1, 1], [], []>} : vector<16x16xbf16>, vector<16x32xbf16>, vector<16x32xf32> -> vector<16x32xf32>
    %16 = arith.addf %14, %15 : vector<16x32xf32>
    %c0_12 = arith.constant 0 : index
    %c0_13 = arith.constant 0 : index
    %c0_14 = arith.constant 0 : index
    %17 = vector.load %arg7[%c0_12, %c0_13, %c0_14] : memref<2x16x32xf32, #tpu.memory_space<vmem>>, vector<1x16x32xf32>
    %18 = vector.shape_cast %17 : vector<1x16x32xf32> to vector<16x32xf32>
    %19 = vector.shape_cast %16 : vector<16x32xf32> to vector<1x16x32xf32>
    tpu.vector_store %arg7[%c0_12, %c0_13, %c0_14], %19 {strides = array<i32>} : memref<2x16x32xf32, #tpu.memory_space<vmem>>, vector<1x16x32xf32>,
    %c0_15 = arith.constant 0 : index
    %c0_16 = arith.constant 0 : index
    %c0_17 = arith.constant 0 : index
    %20 = vector.load %arg8[%c0_15, %c0_16, %c0_17] : memref<2x16x1xf32, #tpu.memory_space<vmem>>, vector<1x16x1xf32>
    %21 = vector.shape_cast %20 : vector<1x16x1xf32> to vector<16x1xf32>
    %cst_18 = arith.constant dense<0.000000e+00> : vector<16x1xf32>
    %22 = tpu.matmul %7, %4, %cst_18 {dimension_numbers = #tpu.dot_dimension_numbers<[0], [0], [1], [1], [0, 1, 1, 1], [], []>} : vector<16x16xbf16>, vector<16x1xbf16>, vector<16x1xf32> -> vector<16x1xf32>
    %23 = arith.addf %21, %22 : vector<16x1xf32>
    %c0_19 = arith.constant 0 : index
    %c0_20 = arith.constant 0 : index
    %c0_21 = arith.constant 0 : index
    %24 = vector.load %arg8[%c0_19, %c0_20, %c0_21] : memref<2x16x1xf32, #tpu.memory_space<vmem>>, vector<1x16x1xf32>
    %25 = vector.shape_cast %24 : vector<1x16x1xf32> to vector<16x1xf32>
    %26 = vector.shape_cast %23 : vector<16x1xf32> to vector<1x16x1xf32>
    tpu.vector_store %arg8[%c0_19, %c0_20, %c0_21], %26 {strides = array<i32>} : memref<2x16x1xf32, #tpu.memory_space<vmem>>, vector<1x16x1xf32>,
    %c1 = arith.constant 1 : index
    %c0_22 = arith.constant 0 : index
    %c0_23 = arith.constant 0 : index
    %27 = vector.load %arg2[%c1, %c0_22, %c0_23] : memref<2x16x16xf32, #tpu.memory_space<vmem>>, vector<1x16x16xf32>
    %28 = vector.shape_cast %27 : vector<1x16x16xf32> to vector<16x16xf32>
    %29 = arith.truncf %28 : vector<16x16xf32> to vector<16x16xbf16>
    %c1_24 = arith.constant 1 : index
    %c0_25 = arith.constant 0 : index
    %c0_26 = arith.constant 0 : index
    %30 = vector.load %arg5[%c1_24, %c0_25, %c0_26] : memref<2x16x1xf32, #tpu.memory_space<vmem>>, vector<1x16x1xf32>
    %31 = vector.shape_cast %30 : vector<1x16x1xf32> to vector<16x1xf32>
    %32 = vector.broadcast %31 : vector<16x1xf32> to vector<16x32xf32>
    %33 = arith.mulf %3, %32 : vector<16x32xf32>
    %34 = arith.truncf %33 : vector<16x32xf32> to vector<16x32xbf16>
    %c1_27 = arith.constant 1 : index
    %c0_28 = arith.constant 0 : index
    %c0_29 = arith.constant 0 : index
    %35 = vector.load %arg7[%c1_27, %c0_28, %c0_29] : memref<2x16x32xf32, #tpu.memory_space<vmem>>, vector<1x16x32xf32>
    %36 = vector.shape_cast %35 : vector<1x16x32xf32> to vector<16x32xf32>
    %cst_30 = arith.constant dense<0.000000e+00> : vector<16x32xf32>
    %37 = tpu.matmul %29, %34, %cst_30 {dimension_numbers = #tpu.dot_dimension_numbers<[0], [0], [1], [1], [0, 1, 1, 1], [], []>} : vector<16x16xbf16>, vector<16x32xbf16>, vector<16x32xf32> -> vector<16x32xf32>
    %38 = arith.addf %36, %37 : vector<16x32xf32>
    %c1_31 = arith.constant 1 : index
    %c0_32 = arith.constant 0 : index
    %c0_33 = arith.constant 0 : index
    %39 = vector.load %arg7[%c1_31, %c0_32, %c0_33] : memref<2x16x32xf32, #tpu.memory_space<vmem>>, vector<1x16x32xf32>
    %40 = vector.shape_cast %39 : vector<1x16x32xf32> to vector<16x32xf32>
    %41 = vector.shape_cast %38 : vector<16x32xf32> to vector<1x16x32xf32>
    tpu.vector_store %arg7[%c1_31, %c0_32, %c0_33], %41 {strides = array<i32>} : memref<2x16x32xf32, #tpu.memory_space<vmem>>, vector<1x16x32xf32>,
    %c1_34 = arith.constant 1 : index
    %c0_35 = arith.constant 0 : index
    %c0_36 = arith.constant 0 : index
    %42 = vector.load %arg8[%c1_34, %c0_35, %c0_36] : memref<2x16x1xf32, #tpu.memory_space<vmem>>, vector<1x16x1xf32>
    %43 = vector.shape_cast %42 : vector<1x16x1xf32> to vector<16x1xf32>
    %cst_37 = arith.constant dense<0.000000e+00> : vector<16x1xf32>
    %44 = tpu.matmul %29, %4, %cst_37 {dimension_numbers = #tpu.dot_dimension_numbers<[0], [0], [1], [1], [0, 1, 1, 1], [], []>} : vector<16x16xbf16>, vector<16x1xbf16>, vector<16x1xf32> -> vector<16x1xf32>
    %45 = arith.addf %43, %44 : vector<16x1xf32>
    %c1_38 = arith.constant 1 : index
    %c0_39 = arith.constant 0 : index
    %c0_40 = arith.constant 0 : index
    %46 = vector.load %arg8[%c1_38, %c0_39, %c0_40] : memref<2x16x1xf32, #tpu.memory_space<vmem>>, vector<1x16x1xf32>
    %47 = vector.shape_cast %46 : vector<1x16x1xf32> to vector<16x1xf32>
    %48 = vector.shape_cast %45 : vector<16x1xf32> to vector<1x16x1xf32>
    tpu.vector_store %arg8[%c1_38, %c0_39, %c0_40], %48 {strides = array<i32>} : memref<2x16x1xf32, #tpu.memory_space<vmem>>, vector<1x16x1xf32>,
    %c0_i32_41 = arith.constant 0 : i32
    %49 = arith.cmpi eq, %arg1, %c0_i32_41 : i32
    %50 = arith.extui %49 : i1 to i32
    %c0_i32_42 = arith.constant 0 : i32
    %51 = arith.cmpi ne, %50, %c0_i32_42 : i32
    scf.if %51 {
      %c0_43 = arith.constant 0 : index
      %c0_44 = arith.constant 0 : index
      %52 = vector.load %arg4[%c0_43, %c0_44] : memref<16x32xf32, #tpu.memory_space<vmem>>, vector<16x32xf32>
      %c0_45 = arith.constant 0 : index
      %c0_46 = arith.constant 0 : index
      %53 = vector.load %arg6[%c0_45, %c0_46] : memref<16x96xf32, #tpu.memory_space<vmem>>, vector<16x32xf32>
      tpu.vector_store %arg6[%c0_45, %c0_46], %52 {strides = array<i32>} : memref<16x96xf32, #tpu.memory_space<vmem>>, vector<16x32xf32>,
      %c0_47 = arith.constant 0 : index
      %c0_48 = arith.constant 0 : index
      %c0_49 = arith.constant 0 : index
      %54 = vector.load %arg8[%c0_47, %c0_48, %c0_49] : memref<2x16x1xf32, #tpu.memory_space<vmem>>, vector<1x16x1xf32>
      %55 = vector.shape_cast %54 : vector<1x16x1xf32> to vector<16x1xf32>
      %cst_50 = arith.constant 0.000000e+00 : f32
      %56 = vector.broadcast %cst_50 : f32 to vector<16x1xf32>
      %57 = arith.cmpf oeq, %55, %56 : vector<16x1xf32>
      %cst_51 = arith.constant 1.000000e+00 : f32
      %58 = vector.broadcast %cst_51 : f32 to vector<16x1xf32>
      %59 = arith.select %57, %58, %55 : vector<16x1xi1>, vector<16x1xf32>
      %60 = math.rsqrt %59 : vector<16x1xf32>
      %c0_52 = arith.constant 0 : index
      %c0_53 = arith.constant 0 : index
      %c0_54 = arith.constant 0 : index
      %61 = vector.load %arg7[%c0_52, %c0_53, %c0_54] : memref<2x16x32xf32, #tpu.memory_space<vmem>>, vector<1x16x32xf32>
      %62 = vector.shape_cast %61 : vector<1x16x32xf32> to vector<16x32xf32>
      %63 = vector.broadcast %60 : vector<16x1xf32> to vector<16x32xf32>
      %64 = arith.mulf %63, %62 : vector<16x32xf32>
      %c0_55 = arith.constant 0 : index
      %c32 = arith.constant 32 : index
      %65 = vector.load %arg6[%c0_55, %c32] : memref<16x96xf32, #tpu.memory_space<vmem>>, vector<16x32xf32>
      tpu.vector_store %arg6[%c0_55, %c32], %64 {strides = array<i32>} : memref<16x96xf32, #tpu.memory_space<vmem>>, vector<16x32xf32>,
      %c1_56 = arith.constant 1 : index
      %c0_57 = arith.constant 0 : index
      %c0_58 = arith.constant 0 : index
      %66 = vector.load %arg8[%c1_56, %c0_57, %c0_58] : memref<2x16x1xf32, #tpu.memory_space<vmem>>, vector<1x16x1xf32>
      %67 = vector.shape_cast %66 : vector<1x16x1xf32> to vector<16x1xf32>
      %cst_59 = arith.constant 0.000000e+00 : f32
      %68 = vector.broadcast %cst_59 : f32 to vector<16x1xf32>
      %69 = arith.cmpf oeq, %67, %68 : vector<16x1xf32>
      %cst_60 = arith.constant 1.000000e+00 : f32
      %70 = vector.broadcast %cst_60 : f32 to vector<16x1xf32>
      %71 = arith.select %69, %70, %67 : vector<16x1xi1>, vector<16x1xf32>
      %72 = math.rsqrt %71 : vector<16x1xf32>
      %c1_61 = arith.constant 1 : index
      %c0_62 = arith.constant 0 : index
      %c0_63 = arith.constant 0 : index
      %73 = vector.load %arg7[%c1_61, %c0_62, %c0_63] : memref<2x16x32xf32, #tpu.memory_space<vmem>>, vector<1x16x32xf32>
      %74 = vector.shape_cast %73 : vector<1x16x32xf32> to vector<16x32xf32>
      %75 = vector.broadcast %72 : vector<16x1xf32> to vector<16x32xf32>
      %76 = arith.mulf %75, %74 : vector<16x32xf32>
      %c0_64 = arith.constant 0 : index
      %c64 = arith.constant 64 : index
      %77 = vector.load %arg6[%c0_64, %c64] : memref<16x96xf32, #tpu.memory_space<vmem>>, vector<16x32xf32>
      tpu.vector_store %arg6[%c0_64, %c64], %76 {strides = array<i32>} : memref<16x96xf32, #tpu.memory_space<vmem>>, vector<16x32xf32>,
    } else {
    }
    return
  }
  func.func @transform_0(%arg0: i32, %arg1: i32) -> (i32, i32, i32) {
    %c0_i32 = arith.constant 0 : i32
    %c0_i32_0 = arith.constant 0 : i32
    return %c0_i32, %arg1, %arg0 : i32, i32, i32
  }
  func.func @transform_1(%arg0: i32, %arg1: i32) -> (i32, i32) {
    %c0_i32 = arith.constant 0 : i32
    %c0_i32_0 = arith.constant 0 : i32
    return %arg1, %c0_i32 : i32, i32
  }
  func.func @transform_2(%arg0: i32, %arg1: i32) -> (i32, i32) {
    %c0_i32 = arith.constant 0 : i32
    %c0_i32_0 = arith.constant 0 : i32
    return %arg0, %c0_i32 : i32, i32
  }
  func.func @transform_3(%arg0: i32, %arg1: i32) -> (i32, i32, i32) {
    %c0_i32 = arith.constant 0 : i32
    %c0_i32_0 = arith.constant 0 : i32
    %c0_i32_1 = arith.constant 0 : i32
    return %c0_i32, %arg1, %c0_i32_0 : i32, i32, i32
  }
  func.func @transform_4(%arg0: i32, %arg1: i32) -> (i32, i32) {
    %c0_i32 = arith.constant 0 : i32
    %c0_i32_0 = arith.constant 0 : i32
    return %arg0, %c0_i32 : i32, i32
  }
}

</mosaic_0001>

<bundles_post_ra>
// kernel: tpu_custom_call.1
= control target key start
LH: loop header
LB: loop body
LE: loop exit
PB: predicated region body
PF: predicated region fallthrough
CT: control target
= control target key end

     0   :  { %9 = vsyncpa [#allocation5], 0  ;;  %s567_s0 = inlined_call_operand.vmem [shape: f32[2,16,16], index: 0, kind: input, shape index: {}]   ;;  %s568_s1 = inlined_call_operand.hbm [shape: f32[16,32], index: 1, kind: input, shape index: {}]   ;;  %s569_s2 = inlined_call_operand.hbm [shape: f32[16,32], index: 2, kind: input, shape index: {}]   ;;  %s570_s3 = inlined_call_operand.vmem [shape: f32[2,16,1], index: 3, kind: input, shape index: {}]   ;;  %s571_s4 = inlined_call_operand.hbm [shape: f32[16,96], index: 4, kind: output, shape index: {}]  }
   0x1   :  { %10 = vsyncpa [#allocation8], 0 }
   0x2   :  { %11 = vsyncpa [#allocation6], 0  ;;  %s18_s17 = sshll.u32 %s568_s1, 4  ;;  %s468_s18 = smov [#allocation4]   ;;  %s19_s17 = int_to_ptr.hbm [resolvable:$true] %s18_s17 }
   0x3   :  { %s20_s19 = sshll.u32 %s468_s18, 4  ;;  %s31_s22 = sshll.u32 %s569_s2, 4  ;;  %s21_s19 = int_to_ptr.vmem [resolvable:$true] %s20_s19  ;;  %s32_s22 = int_to_ptr.hbm [resolvable:$true] %s31_s22 }
   0x4   :  { %s469_s23 = smov 128   ;;  %s470_s24 = smov 8  }
   0x5   :  { %26 = dma.hbm_to_vmem [thread:$0]  %s19_s17, 256, %s21_s19, [#allocation5], %s469_s23, %s469_s23, %s470_s24  }
   0x6   :  { %s471_s25 = smov [#allocation7]  }
   0x7   :  { %s33_s26 = sshll.u32 %s471_s25, 4  ;;  %s34_s26 = int_to_ptr.vmem [resolvable:$true] %s33_s26 }
   0x8   :  { %39 = dma.hbm_to_vmem [thread:$0]  %s32_s22, 256, %s34_s26, [#allocation8], %s469_s23, %s469_s23, %s470_s24  }
   0x9   :  { %462 = dma.done.wait [#allocation5], 256  }
   0xa   :  { %463 = vsyncadd [#allocation5], 4294967040 }
   0xb   :  { %464 = dma.done.wait [#allocation8], 256  }
   0xc   :  { %465 = vsyncadd [#allocation8], 4294967040  ;;  %v472_v0 = vmov 0   ;;  %v68_v1 = vld [vmem:[%s567_s0] sm:$0xff]  ;;  %v69_v2 = vld [vmem:[%s567_s0 + $0x8] sm:$0xff]  ;;  %vm104_vm0 = vcmask 130048  }
   0xd   :  { %380 = vset.pattern.permute.xlu1 %v472_v0  ;;  %381 = vset.pattern.permute.xlu2 %v472_v0  ;;  %v360_v3 = vld [vmem:[%s567_s0 + $0x10] sm:$0xff]  ;;  %v70_v4 = vpack.c.bf16 %v69_v2, %v68_v1  ;;  %v361_v5 = vld [vmem:[%s567_s0 + $0x18] sm:$0xff]  ;;  %v72_v8 = vld [vmem:[%s570_s3 + $0x8] sm:$0xff]  ;;  %v473_v10 = vmov 1065369472   ;;  %vm61_vm1 = vcmask 7168  }
   0xe   :  { %v363_v6 = vld [vmem:[%s570_s3 + $0x18] sm:$0xff]  ;;  %v151_v7 = vpack.c.bf16 %v361_v5, %v360_v3  ;;  %80 = vperm.xlu2 %381, %v72_v8   ;;  %v71_v9 = vld [vmem:[%s570_s3] sm:$0xff]  ;;  %218 = vmatpush.bf16.msra.mxu3 %v473_v10  ;;  %v362_v11 = vld [vmem:[%s570_s3 + $0x10] sm:$0xff]  ;;  %v474_v23 = vmov 0.0   ;;  %vm56_vm2 = vcmask 261120   ;;  %s475_s3 = smov 32  }
   0xf   :  { %162 = vperm.xlu1 %380, %v363_v6   ;;  %136 = vmatpush.bf16.msra.mxu1 %v473_v10  ;;  %v67_v13 = vld [vmem:[#allocation4 + $0x8] sm:$0xff]  ;;  %v66_v17 = vld [vmem:[#allocation4] sm:$0xff]  ;;  %64 = vst.msk [vmem:[#allocation3 + $0x10] sm:$0xff] %vm61_vm1, %v474_v23  ;;  %s476_s14 = smov 64   ;;  %s477_s15 = smov [#allocation9]  }
  0x10   :  { %376 = vxpose.binary.xlu0.c.b16.start.end [1/2] (short) (narrow) %v70_v4, %v151_v7, 16  ;;  %62 = vst.msk [vmem:[#allocation3] sm:$0xff] %vm61_vm1, %v474_v23  ;;  %s342_s16 = sshll.u32 %s477_s15, 4  ;;  %s344_s19 = sshll.u32 %s571_s4, 4  ;;  %s343_s16 = int_to_ptr.vmem [resolvable:$true] %s342_s16  ;;  %s345_s19 = int_to_ptr.hbm [resolvable:$true] %s344_s19 }
  0x11   :  { %63 = vst.msk [vmem:[#allocation3 + $0x8] sm:$0xff] %vm61_vm1, %v474_v23 }
  0x12   :  { %65 = vst.msk [vmem:[#allocation3 + $0x18] sm:$0xff] %vm61_vm1, %v474_v23 }
  0x13   :  { %57 = vst.msk [vmem:[#allocation2] sm:$0xff] %vm56_vm2, %v474_v23 }
  0x14   :  { %58 = vst.msk [vmem:[#allocation2 + $0x8] sm:$0xff] %vm56_vm2, %v474_v23 }
  0x15   :  { %59 = vst.msk [vmem:[#allocation2 + $0x10] sm:$0xff] %vm56_vm2, %v474_v23 }
  0x16   :  { %60 = vst.msk [vmem:[#allocation2 + $0x18] sm:$0xff] %vm56_vm2, %v474_v23  ;;  %v209_v27 = vld [vmem:[#allocation3 + $0x10] sm:$0xff] }
  0x17   :  { %75 = vperm.xlu1 %380, %v71_v9   ;;  %v127_v30 = vld [vmem:[#allocation3] sm:$0xff] }
  0x18   :  { %v128_v39 = vld [vmem:[#allocation3 + $0x8] sm:$0xff] }
  0x19   :  { %v210_v36 = vld [vmem:[#allocation3 + $0x18] sm:$0xff] }
  0x1a   :  { %v86_v29 = vld [vmem:[#allocation2] sm:$0xff] }
  0x1b   :  { %v87_v38 = vld [vmem:[#allocation2 + $0x8] sm:$0xff] }
  0x68   :  { %v81_v15 = vpop.permute.xlu2 %80 }
  0x69   :  { %v84_v18 = vmul.f32 %v81_v15, %v67_v13 }
  0x77   :  { %379 = vset.pattern.permute.xlu0 %v472_v0 }
  0x7e   :  { %157 = vperm.xlu0 %379, %v362_v11  }
  0x81   :  { %v163_v12 = vpop.permute.xlu1 %162 }
  0x82   :  { %v166_v14 = vmul.f32 %v163_v12, %v67_v13 }
  0x89   :  { %v76_v16 = vpop.permute.xlu1 %75 }
  0x8a   :  { %v83_v19 = vmul.f32 %v76_v16, %v66_v17 }
  0x8c   :  { %v85_v20 = vpack.c.bf16 %v84_v18, %v83_v19 }
  0x8e   :  { %115 = vmatpush.bf16.msra.mxu0 %v85_v20  ;;  %v170_v20 = vld [vmem:[#allocation2 + $0x18] sm:$0xff] }
  0xbc   :  { %v377_v21 = vpop.trf.xlu0 }
  0xbd   :  { %365 = vmatmul.msk.bf16.vlgmr.msra.gmra.mxu3 %vm104_vm0, %v377_v21 }
  0xc4   :  { %v378_v22 = vpop.trf.xlu0 }
  0xc5   :  { %358 = vmatmul.msk.bf16.vlgmr.msra.gmra.mxu0 %vm104_vm0, %v378_v22  ;;  %359 = vmatmul.msk.bf16.vlgmr.msra.gmra.mxu1 %vm104_vm0, %v378_v22 }
  0xf0   :  { %v158_v24 = vpop.permute.xlu0 %157 }
  0xf1   :  { %v165_v25 = vmul.f32 %v158_v24, %v66_v17  ;;  %v169_v17 = vld [vmem:[#allocation2 + $0x10] sm:$0xff] }
  0xf3   :  { %v167_v26 = vpack.c.bf16 %v166_v14, %v165_v25 }
  0xf5   :  { %197 = vmatpush.bf16.msra.mxu2 %v167_v26 }
  0xf8   :  { %364 = vmatmul.msk.bf16.vlgmr.msra.gmra.mxu2 %vm104_vm0, %v377_v21 }
 0x140   :  { %v220_v28 = vpop.f32.mrf.mxu3 }
 0x141   :  { %v225_v31 = vadd.f32 %v220_v28, %v209_v27 }
 0x142   :  { %v117_v32 = vpop.f32.mrf.mxu0  ;;  %v138_v33 = vpop.f32.mrf.mxu1 }
 0x143   :  { %227 = vst.msk [vmem:[#allocation3 + $0x10] sm:$0xff] %vm61_vm1, %v225_v31  ;;  %v122_v34 = vadd.f32 %v117_v32, %v86_v29  ;;  %v143_v35 = vadd.f32 %v138_v33, %v127_v30  ;;  %v232_v29 = vld [vmem:[#allocation7] sm:$0xff] }
 0x144   :  { %234 = vst.msk [vmem:[#allocation9] sm:$0xff] %vm56_vm2, %v232_v29 }
 0x145   :  { %125 = vst.msk [vmem:[#allocation2] sm:$0xff] %vm56_vm2, %v122_v34 }
 0x146   :  { %146 = vst.msk [vmem:[#allocation3] sm:$0xff] %vm61_vm1, %v143_v35 }
 0x148   :  { %v222_v37 = vpop.f32.mrf.mxu3 }
 0x149   :  { %v226_v40 = vadd.f32 %v222_v37, %v210_v36  ;;  %v233_v36 = vld [vmem:[#allocation7 + $0x8] sm:$0xff] }
 0x14a   :  { %v119_v41 = vpop.f32.mrf.mxu0  ;;  %v140_v42 = vpop.f32.mrf.mxu1  ;;  %v287_v43 = vld [vmem:[#allocation3 + $0x10] sm:$0xff]  ;;  %235 = vst.msk [vmem:[#allocation9 + $0x8] sm:$0xff] %vm56_vm2, %v233_v36 }
 0x14b   :  { %228 = vst.msk [vmem:[#allocation3 + $0x18] sm:$0xff] %vm61_vm1, %v226_v40  ;;  %v123_v44 = vadd.f32 %v119_v41, %v87_v38  ;;  %v144_v45 = vadd.f32 %v140_v42, %v128_v39  ;;  %vm289_vm3 = vcmp.eq.f32.partialorder %v287_v43, 0.0 }
 0x14c   :  { %v291_v46 = vsel %vm289_vm3, 1.0, %v287_v43  ;;  %v262_v24 = vld [vmem:[#allocation2] sm:$0xff] }
 0x14d   :  { %126 = vst.msk [vmem:[#allocation2 + $0x8] sm:$0xff] %vm56_vm2, %v123_v44  ;;  %v236_v47 = vld [vmem:[#allocation3] sm:$0xff]  ;;  %382 = vrsqrt.f32 %v291_v46  ;;  %vm299_vm12 = vweird.f32 %v291_v46 }
 0x14e   :  { %147 = vst.msk [vmem:[#allocation3 + $0x8] sm:$0xff] %vm61_vm1, %v144_v45  ;;  %vm238_vm4 = vcmp.eq.f32.partialorder %v236_v47, 0.0 }
 0x14f   :  { %v240_v48 = vsel %vm238_vm4, 1.0, %v236_v47  ;;  %vm284_vm4 = vcmask 523520  }
 0x150   :  { %384 = vrsqrt.f32 %v240_v48  ;;  %vm248_vm8 = vweird.f32 %v240_v48 }
 0x152   :  { %v288_v49 = vld [vmem:[#allocation3 + $0x18] sm:$0xff] }
 0x153   :  { %v383_v50 = vpop.eup %382  ;;  %vm290_vm5 = vcmp.eq.f32.partialorder %v288_v49, 0.0 }
 0x154   :  { %v292_v51 = vsel %vm290_vm5, 1.0, %v288_v49  ;;  %v294_v53 = vmul.f32 %v383_v50, %v291_v46  ;;  %vm300_vm10 = vweird.f32 %v383_v50  ;;  %v263_v31 = vld [vmem:[#allocation2 + $0x8] sm:$0xff]  ;;  %vm335_vm5 = vcmask 785920  }
 0x155   :  { %v237_v52 = vld [vmem:[#allocation3 + $0x8] sm:$0xff]  ;;  %386 = vrsqrt.f32 %v292_v51  ;;  %vm301_vm14 = vmor %vm299_vm12, %vm300_vm10  ;;  %vm309_vm1 = vweird.f32 %v292_v51 }
 0x156   :  { %v385_v54 = vpop.eup %384  ;;  %vm239_vm6 = vcmp.eq.f32.partialorder %v237_v52, 0.0  ;;  %v295_v58 = vmul.f32 %v383_v50, %v294_v53 }
 0x157   :  { %v243_v55 = vmul.f32 %v385_v54, %v240_v48  ;;  %v241_v56 = vsel %vm239_vm6, 1.0, %v237_v52  ;;  %vm249_vm7 = vweird.f32 %v385_v54 }
 0x158   :  { %388 = vrsqrt.f32 %v241_v56  ;;  %v296_v62 = vmul.f32 0.5, %v295_v58  ;;  %vm250_vm9 = vmor %vm248_vm8, %vm249_vm7  ;;  %vm258_vm13 = vweird.f32 %v241_v56 }
 0x159   :  { %v244_v57 = vmul.f32 %v385_v54, %v243_v55 }
 0x15a   :  { %v297_v5 = vsub.f32 1.5, %v296_v62 }
 0x15b   :  { %v387_v59 = vpop.eup %386  ;;  %v245_v60 = vmul.f32 0.5, %v244_v57 }
 0x15c   :  { %v304_v63 = vmul.f32 %v387_v59, %v292_v51  ;;  %v298_v9 = vmul.f32 %v383_v50, %v297_v5  ;;  %vm310_vm0 = vweird.f32 %v387_v59 }
 0x15d   :  { %v246_v61 = vsub.f32 1.5, %v245_v60  ;;  %vm311_vm3 = vmor %vm309_vm1, %vm310_vm0 }
 0x15e   :  { %v389_v0 = vpop.eup %388  ;;  %v305_v6 = vmul.f32 %v387_v59, %v304_v63  ;;  %v302_v13 = vsel %vm301_vm14, %v383_v50, %v298_v9 }
 0x15f   :  { %v247_v1 = vmul.f32 %v385_v54, %v246_v61  ;;  %v253_v2 = vmul.f32 %v389_v0, %v241_v56  ;;  %vm259_vm11 = vweird.f32 %v389_v0 }
 0x160   :  { %v306_v10 = vmul.f32 0.5, %v305_v6  ;;  %vm260_vm15 = vmor %vm258_vm13, %vm259_vm11 }
 0x161   :  { %v251_v3 = vsel %vm250_vm9, %v385_v54, %v247_v1  ;;  %v254_v4 = vmul.f32 %v389_v0, %v253_v2 }
 0x162   :  { %266 = vperm.xlu2 %381, %v251_v3   ;;  %v307_v14 = vsub.f32 1.5, %v306_v10 }
 0x163   :  { %v255_v7 = vmul.f32 0.5, %v254_v4 }
 0x164   :  { %v308_v15 = vmul.f32 %v387_v59, %v307_v14 }
 0x165   :  { %v256_v8 = vsub.f32 1.5, %v255_v7 }
 0x166   :  { %v312_v16 = vsel %vm311_vm3, %v387_v59, %v308_v15 }
 0x167   :  { %v257_v11 = vmul.f32 %v389_v0, %v256_v8 }
 0x169   :  { %v261_v12 = vsel %vm260_vm15, %v389_v0, %v257_v11 }
 0x16a   :  { %271 = vperm.xlu1 %380, %v261_v12   ;;  %317 = vperm.xlu2 %381, %v302_v13  }
 0x172   :  { %322 = vperm.xlu1 %380, %v312_v16  }
 0x17b   :  { %v199_v18 = vpop.f32.mrf.mxu2 }
 0x17c   :  { %v204_v19 = vadd.f32 %v199_v18, %v169_v17 }
 0x17e   :  { %206 = vst.msk [vmem:[#allocation2 + $0x10] sm:$0xff] %vm56_vm2, %v204_v19 }
 0x183   :  { %v201_v21 = vpop.f32.mrf.mxu2 }
 0x184   :  { %v205_v22 = vadd.f32 %v201_v21, %v170_v20 }
 0x185   :  { %v313_v27 = vld [vmem:[#allocation2 + $0x10] sm:$0xff] }
 0x186   :  { %207 = vst.msk [vmem:[#allocation2 + $0x18] sm:$0xff] %vm56_vm2, %v205_v22 }
 0x18d   :  { %v314_v34 = vld [vmem:[#allocation2 + $0x18] sm:$0xff] }
 0x1bc   :  { %v267_v23 = vpop.permute.xlu2 %266 }
 0x1bd   :  { %v274_v25 = vmul.f32 %v267_v23, %v262_v24 }
 0x1bf   :  { %278 = vrot.lane.b32.xlu2 %v274_v25, %s475_s3 }
 0x1c4   :  { %v318_v26 = vpop.permute.xlu2 %317 }
 0x1c5   :  { %v325_v28 = vmul.f32 %v318_v26, %v313_v27 }
 0x1c7   :  { %329 = vrot.lane.b32.xlu2 %v325_v28, %s476_s14 }
 0x1dc   :  { %v272_v30 = vpop.permute.xlu1 %271 }
 0x1dd   :  { %v275_v32 = vmul.f32 %v272_v30, %v263_v31 }
 0x1df   :  { %280 = vrot.lane.b32.xlu1 %v275_v32, %s475_s3 }
 0x1e4   :  { %v323_v33 = vpop.permute.xlu1 %322 }
 0x1e5   :  { %v326_v35 = vmul.f32 %v323_v33, %v314_v34 }
 0x1e7   :  { %331 = vrot.lane.b32.xlu1 %v326_v35, %s476_s14 }
 0x219   :  { %v279_v37 = vpop.permute.xlu2 %278 }
 0x21a   :  { %285 = vst.msk [vmem:[#allocation9] sm:$0xff] %vm284_vm4, %v279_v37 }
 0x221   :  { %v330_v38 = vpop.permute.xlu2 %329 }
 0x222   :  { %336 = vst.msk [vmem:[#allocation9] sm:$0xff] %vm335_vm5, %v330_v38 }
 0x251   :  { %v281_v39 = vpop.permute.xlu1 %280 }
 0x252   :  { %286 = vst.msk [vmem:[#allocation9 + $0x8] sm:$0xff] %vm284_vm4, %v281_v39 }
 0x259   :  { %v332_v40 = vpop.permute.xlu1 %331 }
 0x25a   :  { %337 = vst.msk [vmem:[#allocation9 + $0x8] sm:$0xff] %vm335_vm5, %v332_v40 }
 0x25b   :  { %350 = dma.vmem_to_hbm [thread:$0]  %s343_s16, 256, %s345_s19, [#allocation6], %s469_s23, %s469_s23, %s470_s24  }
 0x25c   :  { %466 = dma.done.wait [#allocation6], 256  }
 0x25d   :  { %467 = vsyncadd [#allocation6], 4294967040 }
 0x25e   :  { %355 = vsyncpa [#allocation5], 1 }
 0x25f   :  { %356 = vsyncpa [#allocation8], 1 }
 0x260   :  { %357 = vsyncpa [#allocation6], 1 }

</bundles_post_ra>
